<compile_context>
chip_gen: v7x
topology: tpu7x:2x2x1
jax: 0.10.0
libtpu: 0.0.40
codegen_flags: <defaults>
</compile_context>

<pallas_src>
import jax
import jax.numpy as jnp
from jax.experimental import pallas as pl
from jax.experimental.pallas import tpu as pltpu

LANES = 128


def _rup(n, m=8):
    return (n + m - 1) // m * m


def make_rnn_kernel(layout, V, H, L):
    """Build the gridless kernel; `layout` holds static row offsets into the slab."""

    def lstm_cell(gates):
        # gates: (B, 128); columns packed as [ i (H) | o (H) | g (H) | zero pad ].
        # Forget gate & W_hh terms are omitted (T=1, zero initial state -> exactly 0).
        sig = jax.nn.sigmoid(gates[:, : 2 * H])      # i|o in one contiguous EUP pass
        g = jnp.tanh(gates[:, 2 * H : 3 * H])
        c = sig[:, :H] * g                            # c = i * g   (f*c_prev == 0)
        return sig[:, H : 2 * H] * jnp.tanh(c)        # h = o * tanh(c)

    def kernel(x_ref, p_ref, out_ref):
        # x_ref:   (B, 1)        int32 token indices
        # p_ref:   (rows, 128)   f32 packed parameter slab
        # out_ref: (B, 128)      f32 (lane-dense; logits live in [:, :O])
        B = x_ref.shape[0]

        # Fused embedding + layer-0 gates: one-hot matmul against the folded
        # (V, 3H) table (exact: one-hot rows select a single f32 row).
        idx = x_ref[...]                                            # (B, 1)
        lane = jax.lax.broadcasted_iota(jnp.int32, (B, V), 1)       # (B, V)
        one_hot = (lane == idx).astype(jnp.float32)
        tbl0 = p_ref[layout["g0"] : layout["g0"] + V, :]            # (V, 128)
        gates = jnp.dot(one_hot, tbl0, preferred_element_type=jnp.float32)
        h = lstm_cell(gates)                                        # (B, H)

        # Remaining layers (num_layers is small & static -> unrolled).
        for k in range(L - 1):
            w_off = layout["wih"][k]
            b_off = layout["b"][k]
            w = p_ref[w_off : w_off + H, :]                         # (H, 128)
            b = p_ref[b_off : b_off + 1, :]                         # (1, 128)
            gates = jnp.dot(h, w, preferred_element_type=jnp.float32) + b
            h = lstm_cell(gates)

        # Final Linear (padded to 128 lanes -> unmasked stores).
        wfc = p_ref[layout["wfc"] : layout["wfc"] + H, :]           # (H, 128)
        bfc = p_ref[layout["bfc"] : layout["bfc"] + 1, :]           # (1, 128)
        out_ref[...] = jnp.dot(h, wfc, preferred_element_type=jnp.float32) + bfc

    return kernel


def prep_packed_params(params):
    """Fold / prune / pad all float params into one lane-dense (rows, 128) slab.

    Runs once at param-prep time (constants), so it is free at inference.
    """
    emb_w = params["emb_w"]   # (V, H)
    w_ih = params["w_ih"]     # (L, 4H, H)   gate order i, f, g, o (PyTorch)
    b_ih = params["b_ih"]     # (L, 4H)
    b_hh = params["b_hh"]     # (L, 4H)
    w_fc = params["w_fc"]     # (O, H)
    b_fc = params["b_fc"]     # (O,)

    V, H = emb_w.shape
    L = w_ih.shape[0]
    O = w_fc.shape[0]
    assert 3 * H <= LANES and O <= LANES, "this packing assumes 3H, O <= 128"
    assert w_ih.shape[2] == H, "embedding dim must equal hidden_size"

    def prune_reorder(m4):  # (..., 4H) -> (..., 3H) laid out as i | o | g
        i = m4[..., 0 * H : 1 * H]
        g = m4[..., 2 * H : 3 * H]
        o = m4[..., 3 * H : 4 * H]
        return jnp.concatenate([i, o, g], axis=-1)

    # Static row layout (each block starts on an 8-row sublane boundary).
    rows = 0
    layout = {"wih": [], "b": []}
    layout["g0"] = rows
    rows += _rup(V)
    for _ in range(1, L):
        layout["wih"].append(rows)
        rows += _rup(H)
        layout["b"].append(rows)
        rows += 8
    layout["wfc"] = rows
    rows += _rup(H)
    layout["bfc"] = rows
    rows += 8

    slab = jnp.zeros((rows, LANES), jnp.float32)

    def place(s, r, mat):
        mat = jnp.asarray(mat, jnp.float32)
        return s.at[r : r + mat.shape[0], : mat.shape[1]].set(mat)

    # Layer 0 folded with the embedding: (V, 3H) table.
    g0 = prune_reorder(emb_w @ w_ih[0].T + (b_ih[0] + b_hh[0])[None, :])
    slab = place(slab, layout["g0"], g0)

    # Layers 1..L-1: pruned/reordered input->gate weights and summed biases.
    for k, l in enumerate(range(1, L)):
        slab = place(slab, layout["wih"][k], prune_reorder(w_ih[l].T))
        slab = place(slab, layout["b"][k], prune_reorder((b_ih[l] + b_hh[l])[None, :]))

    # Final Linear, zero-padded to 128 lanes.
    slab = place(slab, layout["wfc"], w_fc.T)
    slab = place(slab, layout["bfc"], b_fc[None, :])

    return {"slab": slab, "layout": layout, "V": V, "H": H, "L": L, "O": O}


def rnn_forward(X, packed):
    slab = packed["slab"]
    B = X.shape[0]
    x_col = X.astype(jnp.int32).reshape(B, 1)

    kernel = make_rnn_kernel(packed["layout"], packed["V"], packed["H"], packed["L"])
    vmem = pl.BlockSpec(memory_space=pltpu.MemorySpace.VMEM)
    out_pad = pl.pallas_call(
        kernel,
        out_shape=jax.ShapeDtypeStruct((B, LANES), jnp.float32),
        in_specs=[vmem, vmem],
        out_specs=vmem,
    )(x_col, slab)
    return out_pad[:, : packed["O"]]


def rnn_reference(X, params):
    """Pure-JAX reference with the FULL LSTM math (W_hh, forget gate, zero state),
    mirroring the PyTorch forward — validates the kernel's zero-state pruning."""
    h = jnp.take(params["emb_w"], X, axis=0)           # (B, H)
    L = params["w_ih"].shape[0]
    H = h.shape[1]
    for l in range(L):
        h_prev = jnp.zeros_like(h)
        c_prev = jnp.zeros_like(h)
        gates = (h @ params["w_ih"][l].T + params["b_ih"][l]
                 + h_prev @ params["w_hh"][l].T + params["b_hh"][l])
        i = jax.nn.sigmoid(gates[:, 0 * H : 1 * H])
        f = jax.nn.sigmoid(gates[:, 1 * H : 2 * H])
        g = jnp.tanh(gates[:, 2 * H : 3 * H])
        o = jax.nn.sigmoid(gates[:, 3 * H : 4 * H])
        c = f * c_prev + i * g
        h = o * jnp.tanh(c)
    return h @ params["w_fc"].T + params["b_fc"]


def make_params(key, input_size, hidden_size, num_layers, out_class_size):
    ks = jax.random.split(key, 7)
    V, H, L, O = input_size, hidden_size, num_layers, out_class_size
    scale = 1.0 / jnp.sqrt(jnp.float32(H))
    return {
        "emb_w": jax.random.normal(ks[0], (V, H), jnp.float32),
        "w_ih": jax.random.uniform(ks[1], (L, 4 * H, H), jnp.float32, -scale, scale),
        "w_hh": jax.random.uniform(ks[2], (L, 4 * H, H), jnp.float32, -scale, scale),
        "b_ih": jax.random.uniform(ks[3], (L, 4 * H), jnp.float32, -scale, scale),
        "b_hh": jax.random.uniform(ks[4], (L, 4 * H), jnp.float32, -scale, scale),
        "w_fc": jax.random.uniform(ks[5], (O, H), jnp.float32, -scale, scale),
        "b_fc": jax.random.uniform(ks[6], (O,), jnp.float32, -scale, scale),
    }


if __name__ == "__main__":
    input_size = 16        # vocab size
    hidden_size = 32
    num_layers = 2
    out_class_size = 10
    batch = 8

    key = jax.random.PRNGKey(0)
    pkey, xkey = jax.random.split(key)
    params = make_params(pkey, input_size, hidden_size, num_layers, out_class_size)
    packed = prep_packed_params(params)
    X = jax.random.randint(xkey, (batch,), 0, input_size, dtype=jnp.int32)

    out = jax.block_until_ready(rnn_forward(X, packed))
    ref = rnn_reference(X, params)

    assert out.shape == (batch, out_class_size)
    assert jnp.allclose(out, ref, atol=1e-4, rtol=1e-4), (
        "max abs err = %g" % float(jnp.max(jnp.abs(out - ref))))

    print("KERNEL_OK")
</pallas_src>

<mosaic_0001>
module attributes {stable_mosaic.version = 11 : i64} {
  func.func @kernel(%arg0: memref<8x1xi32, #tpu.memory_space<vmem>>, %arg1: memref<96x128xf32, #tpu.memory_space<vmem>>, %arg2: memref<8x128xf32, #tpu.memory_space<vmem>>) attributes {dimension_semantics = [], scalar_prefetch = 0 : i64, scratch_operands = 0 : i64, tpu.core_type = #tpu.core_type<tc>} {
    %c0 = arith.constant 0 : index
    %c0_0 = arith.constant 0 : index
    %0 = vector.load %arg0[%c0, %c0_0] : memref<8x1xi32, #tpu.memory_space<vmem>>, vector<8x1xi32>
    %1 = tpu.iota {dimensions = array<i32: 1>} : vector<8x16xi32>
    %2 = vector.broadcast %0 : vector<8x1xi32> to vector<8x16xi32>
    %3 = arith.cmpi eq, %1, %2 : vector<8x16xi32>
    %4 = arith.extui %3 : vector<8x16xi1> to vector<8x16xi32>
    %5 = arith.sitofp %4 : vector<8x16xi32> to vector<8x16xf32>
    %c0_1 = arith.constant 0 : index
    %c0_2 = arith.constant 0 : index
    %6 = vector.load %arg1[%c0_1, %c0_2] : memref<96x128xf32, #tpu.memory_space<vmem>>, vector<16x128xf32>
    %cst = arith.constant dense<0.000000e+00> : vector<8x128xf32>
    %7 = tpu.matmul %5, %6, %cst {dimension_numbers = #tpu.dot_dimension_numbers<[1], [0], [0], [1], [0, 0, 1, 1], [], []>} : vector<8x16xf32>, vector<16x128xf32>, vector<8x128xf32> -> vector<8x128xf32>
    %8 = vector.extract_strided_slice %7 {offsets = [0, 0], sizes = [8, 64], strides = [1, 1]} : vector<8x128xf32> to vector<8x64xf32>
    %9 = arith.negf %8 : vector<8x64xf32>
    %10 = math.exp %9 : vector<8x64xf32>
    %cst_3 = arith.constant 1.000000e+00 : f32
    %11 = vector.broadcast %cst_3 : f32 to vector<8x64xf32>
    %12 = arith.addf %11, %10 : vector<8x64xf32>
    %13 = arith.divf %11, %12 : vector<8x64xf32>
    %14 = vector.extract_strided_slice %7 {offsets = [0, 64], sizes = [8, 32], strides = [1, 1]} : vector<8x128xf32> to vector<8x32xf32>
    %15 = math.tanh %14 : vector<8x32xf32>
    %16 = vector.extract_strided_slice %13 {offsets = [0, 0], sizes = [8, 32], strides = [1, 1]} : vector<8x64xf32> to vector<8x32xf32>
    %17 = arith.mulf %16, %15 : vector<8x32xf32>
    %18 = vector.extract_strided_slice %13 {offsets = [0, 32], sizes = [8, 32], strides = [1, 1]} : vector<8x64xf32> to vector<8x32xf32>
    %19 = math.tanh %17 : vector<8x32xf32>
    %20 = arith.mulf %18, %19 : vector<8x32xf32>
    %c16 = arith.constant 16 : index
    %c0_4 = arith.constant 0 : index
    %21 = vector.load %arg1[%c16, %c0_4] : memref<96x128xf32, #tpu.memory_space<vmem>>, vector<32x128xf32>
    %c48 = arith.constant 48 : index
    %c0_5 = arith.constant 0 : index
    %22 = vector.load %arg1[%c48, %c0_5] : memref<96x128xf32, #tpu.memory_space<vmem>>, vector<1x128xf32>
    %cst_6 = arith.constant dense<0.000000e+00> : vector<8x128xf32>
    %23 = tpu.matmul %20, %21, %cst_6 {dimension_numbers = #tpu.dot_dimension_numbers<[1], [0], [0], [1], [0, 0, 1, 1], [], []>} : vector<8x32xf32>, vector<32x128xf32>, vector<8x128xf32> -> vector<8x128xf32>
    %24 = vector.broadcast %22 : vector<1x128xf32> to vector<8x128xf32>
    %25 = arith.addf %23, %24 : vector<8x128xf32>
    %26 = vector.extract_strided_slice %25 {offsets = [0, 0], sizes = [8, 64], strides = [1, 1]} : vector<8x128xf32> to vector<8x64xf32>
    %27 = arith.negf %26 : vector<8x64xf32>
    %28 = math.exp %27 : vector<8x64xf32>
    %cst_7 = arith.constant 1.000000e+00 : f32
    %29 = vector.broadcast %cst_7 : f32 to vector<8x64xf32>
    %30 = arith.addf %29, %28 : vector<8x64xf32>
    %31 = arith.divf %29, %30 : vector<8x64xf32>
    %32 = vector.extract_strided_slice %25 {offsets = [0, 64], sizes = [8, 32], strides = [1, 1]} : vector<8x128xf32> to vector<8x32xf32>
    %33 = math.tanh %32 : vector<8x32xf32>
    %34 = vector.extract_strided_slice %31 {offsets = [0, 0], sizes = [8, 32], strides = [1, 1]} : vector<8x64xf32> to vector<8x32xf32>
    %35 = arith.mulf %34, %33 : vector<8x32xf32>
    %36 = vector.extract_strided_slice %31 {offsets = [0, 32], sizes = [8, 32], strides = [1, 1]} : vector<8x64xf32> to vector<8x32xf32>
    %37 = math.tanh %35 : vector<8x32xf32>
    %38 = arith.mulf %36, %37 : vector<8x32xf32>
    %c56 = arith.constant 56 : index
    %c0_8 = arith.constant 0 : index
    %39 = vector.load %arg1[%c56, %c0_8] : memref<96x128xf32, #tpu.memory_space<vmem>>, vector<32x128xf32>
    %c88 = arith.constant 88 : index
    %c0_9 = arith.constant 0 : index
    %40 = vector.load %arg1[%c88, %c0_9] : memref<96x128xf32, #tpu.memory_space<vmem>>, vector<1x128xf32>
    %cst_10 = arith.constant dense<0.000000e+00> : vector<8x128xf32>
    %41 = tpu.matmul %38, %39, %cst_10 {dimension_numbers = #tpu.dot_dimension_numbers<[1], [0], [0], [1], [0, 0, 1, 1], [], []>} : vector<8x32xf32>, vector<32x128xf32>, vector<8x128xf32> -> vector<8x128xf32>
    %42 = vector.broadcast %40 : vector<1x128xf32> to vector<8x128xf32>
    %43 = arith.addf %41, %42 : vector<8x128xf32>
    %c0_11 = arith.constant 0 : index
    %c0_12 = arith.constant 0 : index
    %44 = vector.load %arg2[%c0_11, %c0_12] : memref<8x128xf32, #tpu.memory_space<vmem>>, vector<8x128xf32>
    tpu.vector_store %arg2[%c0_11, %c0_12], %43 {strides = array<i32>} : memref<8x128xf32, #tpu.memory_space<vmem>>, vector<8x128xf32>,
    return
  }
}

</mosaic_0001>

<bundles_post_ra>
// kernel: tpu_custom_call.1
= control target key start
LH: loop header
LB: loop body
LE: loop exit
PB: predicated region body
PF: predicated region fallthrough
CT: control target
= control target key end

     0   :  { %7 = vsyncpa [#allocation3], 0  ;;  %s539_s0 = inlined_call_operand.vmem [shape: s32[8,1], index: 0, kind: input, shape index: {}]   ;;  %s540_s1 = inlined_call_operand.hbm [shape: f32[96,128], index: 1, kind: input, shape index: {}]   ;;  %s541_s2 = inlined_call_operand.hbm [shape: f32[8,128], index: 2, kind: output, shape index: {}]  }
   0x1   :  { %8 = vsyncpa [#allocation4], 0  ;;  %s473_s9 = smov [#allocation2]   ;;  %s425_s13 = scalar_lea.hbm %s540_s1, 1536 }
   0x2   :  { %s16_s10 = sshll.u32 %s473_s9, 4  ;;  %p426_p0 = scmp.ne.s32.totalorder %s540_s1, %s425_s13  ;;  %s17_s10 = int_to_ptr.vmem [resolvable:$true] %s16_s10 }
   0x3   :  { %p429_p1 = scmp.lt.u32.totalorder %s425_s13, %s540_s1 }
   0x5   :  { %p431_p2 = pnand %p429_p1, %p426_p0 }
   0x7   :  { %434 = shalt.err (!%p431_p2)
}
   0x8   :  { %s435_s18 = scalar_lea.vmem %s17_s10, 1536  ;;  %p440_p4 = scmp.lt.s32.totalorder %s17_s10, %s17_s10 }
   0x9   :  { %p436_p3 = scmp.ne.s32.totalorder %s17_s10, %s435_s18  ;;  %p441_p5 = scmp.lt.s32.totalorder %s435_s18, %s435_s18 }
   0xb   :  { %p442_p6 = por %p441_p5, %p440_p4 }
   0xd   :  { %p443_p7 = pnand %p442_p6, %p436_p3 }
   0xf   :  { %446 = shalt.err (!%p443_p7)
}
  0x10   :  { %s474_s19 = smov 128   ;;  %s475_s20 = smov 8  }
  0x11   :  { %22 = dma.hbm_to_vmem [thread:$0]  %s540_s1, 1536, %s17_s10, [#allocation3], %s474_s19, %s474_s19, %s475_s20  }
  0x12   :  { %469 = dma.done.wait [#allocation3], 1536  }
  0x13   :  { %470 = vsyncadd [#allocation3], 4294965760  ;;  %v476_v0 = vmov 0   ;;  %v477_v1 = vmov 0.0|0.0   ;;  %v26_v2 = vld [vmem:[%s539_s0] sm:$0xff]  ;;  %v36_v4 = vld [vmem:[#allocation2 + $0x8] sm:$0xff]  ;;  %v27_v7 = vlaneseq }
  0x14   :  { %408 = vset.pattern.permute.xlu0 %v476_v0  ;;  %382 = vmatprep.subr.bf16.mxu0 %v477_v1  ;;  %v35_v3 = vld [vmem:[#allocation2] sm:$0xff]  ;;  %vm478_vm0 = vmmov 0   ;;  %v479_v6 = vmov 0.0   ;;  %vm37_vm1 = vcmask 130048   ;;  %s480_s0 = smov 64   ;;  %v129_v20 = vld [vmem:[#allocation2 + $0x10] sm:$0xff] }
  0x15   :  { %385 = vmatprep.subr.bf16.mxu1 %v477_v1  ;;  %30 = vperm.xlu0 %408, %v26_v2   ;;  %v383_v5 = vpack.c.bf16 %v36_v4, %v35_v3  ;;  %v28_v8 = vand.u32 127, %v27_v7  ;;  %v130_v21 = vld [vmem:[#allocation2 + $0x18] sm:$0xff]  ;;  %v131_v22 = vld [vmem:[#allocation2 + $0x20] sm:$0xff]  ;;  %v132_v24 = vld [vmem:[#allocation2 + $0x28] sm:$0xff]  ;;  %s481_s1 = smov 32   ;;  %s482_s25 = smov 96  }
  0x16   :  { %357 = vmatprep.mubr.msk.f32.mxu0 %vm478_vm0, %v479_v6  ;;  %368 = vmatprep.mubr.msk.f32.mxu1 %vm478_vm0, %v479_v6  ;;  %v386_v23 = vpack.c.bf16 %v130_v21, %v129_v20  ;;  %v389_v25 = vpack.c.bf16 %v132_v24, %v131_v22  ;;  %vm141_vm3 = vcmask 261120   ;;  %v335_v30 = vld [vmem:[#allocation2 + $0x30] ss:$0 sm:$0xff]  ;;  %v232_v41 = vld [vmem:[#allocation2 + $0x38] sm:$0xff]  ;;  %v233_v42 = vld [vmem:[#allocation2 + $0x40] sm:$0xff]  ;;  %s483_s26 = smov [#allocation5]  }
  0x17   :  { %384 = vmatpush3.bf16.msra.mxu0 %v383_v5  ;;  %v234_v43 = vld [vmem:[#allocation2 + $0x48] sm:$0xff]  ;;  %v392_v44 = vpack.c.bf16 %v233_v42, %v232_v41  ;;  %v235_v45 = vld [vmem:[#allocation2 + $0x50] sm:$0xff]  ;;  %v338_v51 = vld [vmem:[#allocation2 + $0x58] ss:$0 sm:$0xff]  ;;  %s323_s27 = sshll.u32 %s483_s26, 4  ;;  %s324_s27 = int_to_ptr.vmem [resolvable:$true] %s323_s27 }
  0x18   :  { %391 = vmatprep.subr.bf16.mxu0 %v477_v1  ;;  %387 = vmatpush3.bf16.msra.mxu1 %v386_v23  ;;  %v395_v46 = vpack.c.bf16 %v235_v45, %v234_v43  ;;  %s447_s28 = scalar_lea.vmem %s324_s27, 128  ;;  %p452_p9 = scmp.lt.s32.totalorder %s324_s27, %s324_s27 }
  0x19   :  { %388 = vmatprep.subr.bf16.mxu1 %v477_v1  ;;  %p448_p8 = scmp.ne.s32.totalorder %s324_s27, %s447_s28  ;;  %p453_p10 = scmp.lt.s32.totalorder %s447_s28, %s447_s28 }
  0x1b   :  { %p454_p11 = por %p453_p10, %p452_p9 }
  0x1c   :  { %390 = vmatpush3.bf16.msra.mxu1 %v389_v25 }
  0x1d   :  { %p455_p12 = pnand %p454_p11, %p448_p8 }
  0x94   :  { %v31_v9 = vpop.permute.xlu0 %30 }
  0x95   :  { %vm32_vm2 = vcmp.eq.s32.totalorder %v28_v8, %v31_v9 }
  0x96   :  { %v332_v10 = vsel %vm32_vm2, 1.0, %v479_v6 }
  0x97   :  { %358 = vmatmul.mubr.msk.f32.vlgmr.msra.gmra.mrb[0].mxu0 %vm37_vm1, %v332_v10 }
  0x98   :  { %379 = vmatprep.mubr.msk.f32.mxu0 %vm478_vm0, %v479_v6  ;;  %393 = vmatpush3.bf16.msra.mxu0 %v392_v44 }
  0x99   :  { %394 = vmatprep.subr.bf16.mxu0 %v477_v1 }
  0x9c   :  { %396 = vmatpush3.bf16.msra.mxu0 %v395_v46 }
 0x16a   :  { %v107_v11 = vpop.f32.mrb[0].mxu0 }
 0x16b   :  { %409 = vtanh.f32 %v107_v11  ;;  %v359_v12 = vpop.f32.mrb[1].mxu0  ;;  %v334_v14 = vmul.f32 -1.442695, %v107_v11 }
 0x16d   :  { %411 = vpow2.f32 %v334_v14 }
 0x175   :  { %v410_v13 = vpop.eup %409 }
 0x176   :  { %119 = vrot.lane.b32.xlu0 %v410_v13, %s480_s0 }
 0x177   :  { %v412_v15 = vpop.eup %411 }
 0x178   :  { %v114_v16 = vadd.f32 1.0, %v412_v15 }
 0x17a   :  { %413 = vrcp.f32 %v114_v16 }
 0x184   :  { %v414_v17 = vpop.eup %413 }
 0x1e8   :  { %v120_v18 = vpop.permute.xlu0 %119 }
 0x1e9   :  { %v122_v19 = vmul.f32 %v414_v17, %v120_v18 }
 0x1eb   :  { %415 = vtanh.f32 %v122_v19 }
 0x1f5   :  { %v416_v26 = vpop.eup %415 }
 0x1f6   :  { %125 = vrot.lane.b32.xlu1 %v416_v26, %s481_s1 }
 0x268   :  { %v126_v27 = vpop.permute.xlu1 %125 }
 0x269   :  { %v128_v28 = vmul.f32 %v414_v17, %v126_v27 }
 0x26b   :  { %139 = vrot.lane.b32.xlu1 %v128_v28, %s482_s25 }
 0x2dd   :  { %v140_v29 = vpop.permute.xlu1 %139 }
 0x2de   :  { %369 = vmatmul.mubr.msk.f32.vlgmr.msra.gmra.mrb[0].mxu1 %vm141_vm3, %v140_v29 }
 0x3b1   :  { %v210_v31 = vpop.f32.mrb[0].mxu1 }
 0x3b2   :  { %v211_v32 = vadd.f32 %v335_v30, %v210_v31  ;;  %v370_v33 = vpop.f32.mrb[1].mxu1 }
 0x3b4   :  { %417 = vtanh.f32 %v211_v32  ;;  %v337_v35 = vmul.f32 -1.442695, %v211_v32 }
 0x3b6   :  { %419 = vpow2.f32 %v337_v35 }
 0x3be   :  { %v418_v34 = vpop.eup %417 }
 0x3bf   :  { %222 = vrot.lane.b32.xlu0 %v418_v34, %s480_s0 }
 0x3c0   :  { %v420_v36 = vpop.eup %419 }
 0x3c1   :  { %v217_v37 = vadd.f32 1.0, %v420_v36 }
 0x3c3   :  { %421 = vrcp.f32 %v217_v37 }
 0x3cd   :  { %v422_v38 = vpop.eup %421 }
 0x431   :  { %v223_v39 = vpop.permute.xlu0 %222 }
 0x432   :  { %v225_v40 = vmul.f32 %v422_v38, %v223_v39 }
 0x434   :  { %423 = vtanh.f32 %v225_v40 }
 0x43e   :  { %v424_v47 = vpop.eup %423 }
 0x43f   :  { %228 = vrot.lane.b32.xlu1 %v424_v47, %s481_s1 }
 0x4b1   :  { %v229_v48 = vpop.permute.xlu1 %228 }
 0x4b2   :  { %v231_v49 = vmul.f32 %v422_v38, %v229_v48 }
 0x4b4   :  { %242 = vrot.lane.b32.xlu0 %v231_v49, %s482_s25 }
 0x526   :  { %v243_v50 = vpop.permute.xlu0 %242 }
 0x527   :  { %380 = vmatmul.mubr.msk.f32.vlgmr.msra.gmra.mrb[2].mxu0 %vm141_vm3, %v243_v50 }
 0x5fa   :  { %v312_v52 = vpop.f32.mrb[2].mxu0 }
 0x5fb   :  { %v313_v53 = vadd.f32 %v338_v51, %v312_v52  ;;  %v381_v54 = vpop.f32.mrb[3].mxu0 }
 0x5fd   :  { %316 = vst [vmem:[#allocation5] sm:$0xff] %v313_v53 }
 0x5fe   :  { %458 = shalt.err (!%p455_p12)
}
 0x5ff   :  { %s459_s3 = scalar_lea.hbm %s541_s2, 128 }
 0x600   :  { %p460_p13 = scmp.ne.s32.totalorder %s541_s2, %s459_s3  ;;  %p463_p0 = scmp.lt.u32.totalorder %s459_s3, %s541_s2 }
 0x602   :  { %p465_p1 = pnand %p463_p0, %p460_p13 }
 0x604   :  { %468 = shalt.err (!%p465_p1)
}
 0x605   :  { %326 = dma.vmem_to_hbm [thread:$0]  %s324_s27, 128, %s541_s2, [#allocation4]  }
 0x606   :  { %471 = dma.done.wait [#allocation4], 128  }
 0x607   :  { %472 = vsyncadd [#allocation4], 4294967168 }
 0x608   :  { %330 = vsyncpa [#allocation3], 1 }
 0x609   :  { %331 = vsyncpa [#allocation4], 1 }

</bundles_post_ra>
